<compile_context>
chip_gen: v7x
topology: tpu7x:2x2x1
jax: 0.10.0
libtpu: 0.0.40
codegen_flags: <defaults>
</compile_context>

<pallas_src>
import functools

import jax
import jax.numpy as jnp
from jax.experimental import pallas as pl
from jax.experimental.pallas import tpu as pltpu


# ----------------------------- kernel bodies --------------------------------


def _attn_kernel_body(x_ref, wqkv_ref, wout_ref, bout_ref, o_ref, bias_ref, *,
                      block_b, seq_len, d_pad, exp_dtype):
    # x_ref:    (block_b*N, dim_in)     flattened activation block
    # wqkv_ref: (dim_in, 3*d_pad)       fused, lane-padded QKV weight (q pre-scaled)
    # wout_ref: (d_pad, dim_out_p)      lane-padded output projection
    # bout_ref: (1, dim_out_p)
    # bias_ref: (N, N) additive causal bias (0 / -1e30) or None
    # o_ref:    (block_b*N, dim_out_p)
    in_dtype = x_ref.dtype
    rows = block_b * seq_len

    # One fused MXU projection (single RHS push); accumulate in f32.
    qkv = jnp.dot(x_ref[...], wqkv_ref[...], preferred_element_type=jnp.float32)

    # 128-aligned slices are free; cast back to the MXU-native input dtype.
    q = qkv[:, :d_pad].astype(in_dtype).reshape(block_b, seq_len, d_pad)
    k = qkv[:, d_pad:2 * d_pad].astype(in_dtype).reshape(block_b, seq_len, d_pad)
    v = qkv[:, 2 * d_pad:].astype(in_dtype).reshape(block_b, seq_len, d_pad)

    # Similarity (scale already folded into the q weight columns).
    sim = jnp.einsum('bqd,bkd->bqk', q, k,
                     preferred_element_type=jnp.float32)          # (TB, N, N) f32

    if bias_ref is not None:
        sim = sim + bias_ref[...][None, :, :]

    # Numerically stable softmax; EUP exp (bf16 on v6e/v7x when activations are
    # bf16), EUP approximate reciprocal for the denominator.
    sim_max = jnp.max(sim, axis=-1, keepdims=True)
    if exp_dtype == jnp.float32:
        p = jnp.exp(sim - sim_max)
    else:
        p = jnp.exp((sim - sim_max).astype(exp_dtype)).astype(jnp.float32)
    denom = jnp.sum(p, axis=-1, keepdims=True)
    attn = p * pl.reciprocal(denom, approx=True)

    # Weighted sum of values (probs cast back to input dtype for the MXU).
    out = jnp.einsum('bqk,bkd->bqd', attn.astype(in_dtype), v,
                     preferred_element_type=jnp.float32)          # (TB, N, d_pad)

    # Output projection + bias (lane-dense padded width).
    out2d = out.reshape(rows, d_pad).astype(in_dtype)
    y = jnp.dot(out2d, wout_ref[...], preferred_element_type=jnp.float32)
    y = y + bout_ref[...].astype(jnp.float32)
    o_ref[...] = y.astype(o_ref.dtype)


def _attn_kernel(x_ref, wqkv_ref, wout_ref, bout_ref, o_ref, **kw):
    _attn_kernel_body(x_ref, wqkv_ref, wout_ref, bout_ref, o_ref, None, **kw)


def _attn_kernel_causal(x_ref, wqkv_ref, wout_ref, bout_ref, bias_ref, o_ref, **kw):
    _attn_kernel_body(x_ref, wqkv_ref, wout_ref, bout_ref, o_ref, bias_ref, **kw)


# ----------------------------- sizing helpers -------------------------------


def _device_kind() -> str:
    try:
        return jax.devices()[0].device_kind.lower()
    except Exception:
        return ""


def _is_v7x(kind: str) -> bool:
    return ("v7" in kind) or ("7x" in kind)


def _is_v5e(kind: str) -> bool:
    return ("v5 lite" in kind) or ("v5e" in kind) or ("v5litepod" in kind)


def _step_vmem_bytes(block_b, n, dim_in, d_pad, dim_out_p, itemsize):
    """Rough per-grid-step live VMEM estimate (double-buffered blocks + f32 temps)."""
    rows = block_b * n
    x_blk = 2 * rows * dim_in * itemsize
    out_blk = 2 * rows * dim_out_p * itemsize
    weights = 2 * (dim_in * 3 * d_pad + d_pad * dim_out_p + dim_out_p) * itemsize
    qkv = rows * 3 * d_pad * 4
    scores = 3 * block_b * n * n * 4            # sim / p / attn in f32
    pv = rows * d_pad * 4 + rows * dim_out_p * 4
    return x_blk + out_blk + weights + qkv + scores + pv


def _pick_block_b(B, N, dim_in, d_pad, dim_out_p, itemsize, kind):
    """Largest batch fold per grid step that fits the per-generation VMEM budget.
    v5e/v6e (single TC, 128 MiB VMEM): maximize the block. v7x (2 TCs, 64 MiB):
    tighter budget and prefer >=2 grid steps so both cores get work."""
    budget = (40 if _is_v7x(kind) else 96) * 1024 * 1024
    cands = [d for d in range(1, B + 1)
             if B % d == 0 and ((d * N) % 8 == 0 or d == B)]
    block_b = cands[0]
    for d in cands:  # ascending; keep the largest that fits
        if _step_vmem_bytes(d, N, dim_in, d_pad, dim_out_p, itemsize) <= budget:
            block_b = d
    if _is_v7x(kind) and B // block_b < 2:
        for d in sorted(cands, reverse=True):
            if (B // d >= 2 and
                    _step_vmem_bytes(d, N, dim_in, d_pad, dim_out_p,
                                     itemsize) <= budget):
                block_b = d
                break
    return block_b


# ------------------------------- wrapper -------------------------------------


def attention_pallas(x, w_qkv, w_out, b_out, *, causal=False, block_b=None,
                     exp_dtype=None):
    B, N, dim_in = x.shape
    dim_inner = w_qkv.shape[1] // 3
    dim_out = w_out.shape[1]
    scale = float(dim_inner) ** -0.5
    kind = _device_kind()
    itemsize = x.dtype.itemsize

    # Lane-dense padded widths (multiples of 128).
    d_pad = ((dim_inner + 127) // 128) * 128
    dim_out_p = ((dim_out + 127) // 128) * 128

    # Fuse + pad the QKV weight; fold the softmax scale into the q columns.
    w_q, w_k, w_v = jnp.split(w_qkv, 3, axis=1)           # each (dim_in, dim_inner)
    w_q = (w_q.astype(jnp.float32) * scale).astype(w_qkv.dtype)
    pad_cols = ((0, 0), (0, d_pad - dim_inner))
    w_qkv_p = jnp.concatenate(
        [jnp.pad(w_q, pad_cols), jnp.pad(w_k, pad_cols), jnp.pad(w_v, pad_cols)],
        axis=1)                                            # (dim_in, 3*d_pad)

    w_out_p = jnp.pad(w_out, ((0, d_pad - dim_inner), (0, dim_out_p - dim_out)))
    b_out2d = jnp.pad(b_out, (0, dim_out_p - dim_out)).reshape(1, dim_out_p)

    if block_b is None:
        block_b = _pick_block_b(B, N, dim_in, d_pad, dim_out_p, itemsize, kind)
    assert B % block_b == 0, "block_b must divide the batch size"
    assert (block_b * N) % 8 == 0 or block_b == B, "rows/step must be 8-aligned"
    grid = (B // block_b,)

    if exp_dtype is None:
        # bf16 exp ~doubles EUP throughput on v6e/v7x; keep f32 on v5e (no bf16
        # EUP/VPU) and for f32 activations (numerical parity with the module).
        exp_dtype = (jnp.bfloat16
                     if (x.dtype == jnp.bfloat16 and not _is_v5e(kind))
                     else jnp.float32)

    # Flatten in the wrapper (free XLA reshape) so the kernel sees a 2-D block.
    x2d = x.reshape(B * N, dim_in)

    static = dict(block_b=block_b, seq_len=N, d_pad=d_pad, exp_dtype=exp_dtype)
    in_specs = [
        pl.BlockSpec((block_b * N, dim_in), lambda b: (b, 0)),
        pl.BlockSpec((dim_in, 3 * d_pad), lambda b: (0, 0)),
        pl.BlockSpec((d_pad, dim_out_p), lambda b: (0, 0)),
        pl.BlockSpec((1, dim_out_p), lambda b: (0, 0)),
    ]
    inputs = [x2d, w_qkv_p, w_out_p, b_out2d]

    if causal:
        row = jnp.arange(N)[:, None]
        col = jnp.arange(N)[None, :]
        bias = jnp.where(col > row, jnp.float32(-1e30), jnp.float32(0.0))  # (N, N)
        in_specs.append(pl.BlockSpec((N, N), lambda b: (0, 0)))
        inputs.append(bias)
        kernel = functools.partial(_attn_kernel_causal, **static)
    else:
        kernel = functools.partial(_attn_kernel, **static)

    need = _step_vmem_bytes(block_b, N, dim_in, d_pad, dim_out_p, itemsize)
    cap = (56 if _is_v7x(kind) else 100) * 1024 * 1024
    vmem_limit = int(min(cap, max(32 * 1024 * 1024, int(need * 1.5))))

    flops = int(2 * B * N * dim_in * 3 * d_pad          # QKV projection
                + 4 * B * N * N * d_pad                 # QK^T + PV
                + 2 * B * N * d_pad * dim_out_p)        # output projection
    transcendentals = int(B * N * N + B * N)
    bytes_accessed = int(x.size * itemsize
                         + w_qkv_p.size * w_qkv_p.dtype.itemsize
                         + w_out_p.size * w_out_p.dtype.itemsize
                         + b_out2d.size * b_out2d.dtype.itemsize
                         + B * N * dim_out_p * itemsize)

    y2d = pl.pallas_call(
        kernel,
        out_shape=jax.ShapeDtypeStruct((B * N, dim_out_p), x.dtype),
        grid_spec=pltpu.PrefetchScalarGridSpec(
            num_scalar_prefetch=0,
            grid=grid,
            in_specs=in_specs,
            out_specs=pl.BlockSpec((block_b * N, dim_out_p), lambda b: (b, 0)),
        ),
        compiler_params=pltpu.CompilerParams(
            dimension_semantics=("parallel",),
            vmem_limit_bytes=vmem_limit,
        ),
        cost_estimate=pl.CostEstimate(
            flops=flops,
            transcendentals=transcendentals,
            bytes_accessed=bytes_accessed,
        ),
    )(*inputs)

    y = y2d.reshape(B, N, dim_out_p)
    return y[..., :dim_out] if dim_out_p != dim_out else y


# ----------------------------- pure-JAX reference ----------------------------


def attention_reference(x, w_qkv, w_out, b_out, *, causal=False):
    dim_inner = w_qkv.shape[1] // 3
    scale = float(dim_inner) ** -0.5
    qkv = jnp.einsum('bnd,de->bne', x, w_qkv)
    q, k, v = jnp.split(qkv, 3, axis=-1)
    sim = jnp.einsum('bid,bjd->bij', q, k) * scale
    if causal:
        n = sim.shape[-1]
        mask = jnp.triu(jnp.ones((n, n), dtype=bool), 1)
        sim = jnp.where(mask[None], -jnp.finfo(sim.dtype).max, sim)
    attn = jax.nn.softmax(sim, axis=-1)
    out = jnp.einsum('bij,bjd->bid', attn, v)
    return jnp.einsum('bid,de->bie', out, w_out) + b_out


# ----------------------------------- test ------------------------------------


if __name__ == "__main__":
    key = jax.random.PRNGKey(0)
    k_x, k_qkv, k_w, k_b = jax.random.split(key, 4)

    B, N = 2, 8
    dim_in, dim_out, dim_inner = 32, 32, 16

    x = jax.random.normal(k_x, (B, N, dim_in), dtype=jnp.float32)
    # Deterministic synthetic parameters (shapes from the module __init__),
    # stored as (in, out) so the kernel computes x @ W (== PyTorch x @ W.T).
    w_qkv = jax.random.normal(k_qkv, (dim_in, dim_inner * 3), dtype=jnp.float32) * 0.1
    w_out = jax.random.normal(k_w, (dim_inner, dim_out), dtype=jnp.float32) * 0.1
    b_out = jax.random.normal(k_b, (dim_out,), dtype=jnp.float32) * 0.1

    # f32 path (f32 exp; tolerance loosened slightly for the EUP approx recip).
    for causal in (False, True):
        y = jax.block_until_ready(
            attention_pallas(x, w_qkv, w_out, b_out, causal=causal))
        y_ref = attention_reference(x, w_qkv, w_out, b_out, causal=causal)
        assert y.shape == (B, N, dim_out)
        assert jnp.allclose(y, y_ref, atol=2e-3, rtol=2e-3), \
            f"f32 mismatch vs reference (causal={causal})"

    # bf16 path: bf16 MXU operands throughout, bf16 exp on v6e/v7x.
    xb = x.astype(jnp.bfloat16)
    wqb = w_qkv.astype(jnp.bfloat16)
    wob = w_out.astype(jnp.bfloat16)
    bob = b_out.astype(jnp.bfloat16)
    yb = jax.block_until_ready(attention_pallas(xb, wqb, wob, bob, causal=True))
    yb_ref = attention_reference(xb.astype(jnp.float32), wqb.astype(jnp.float32),
                                 wob.astype(jnp.float32), bob.astype(jnp.float32),
                                 causal=True)
    assert yb.shape == (B, N, dim_out)
    assert jnp.allclose(yb.astype(jnp.float32), yb_ref, atol=6e-2, rtol=6e-2), \
        "bf16 mismatch vs f32 reference"

    print("KERNEL_OK")
</pallas_src>

<mosaic_0001>
module attributes {stable_mosaic.version = 11 : i64} {
  func.func @_attn_kernel(%arg0: i32, %arg1: memref<16x32xf32, #tpu.memory_space<vmem>>, %arg2: memref<32x384xf32, #tpu.memory_space<vmem>>, %arg3: memref<128x128xf32, #tpu.memory_space<vmem>>, %arg4: memref<1x128xf32, #tpu.memory_space<vmem>>, %arg5: memref<16x128xf32, #tpu.memory_space<vmem>>) attributes {dimension_semantics = [#tpu.dimension_semantics<parallel>], iteration_bounds = array<i64: 1>, scalar_prefetch = 0 : i64, scratch_operands = 0 : i64, tpu.core_type = #tpu.core_type<tc>, window_params = [{transform_indices = @transform_0, window_bounds = array<i64: 16, 32>}, {pipeline_mode = #tpu.pipeline_mode<synchronous>, transform_indices = @transform_1, window_bounds = array<i64: 32, 384>}, {pipeline_mode = #tpu.pipeline_mode<synchronous>, transform_indices = @transform_2, window_bounds = array<i64: 128, 128>}, {pipeline_mode = #tpu.pipeline_mode<synchronous>, transform_indices = @transform_3, window_bounds = array<i64: 1, 128>}, {transform_indices = @transform_4, window_bounds = array<i64: 16, 128>}]} {
    %c0 = arith.constant 0 : index
    %c0_0 = arith.constant 0 : index
    %0 = vector.load %arg1[%c0, %c0_0] : memref<16x32xf32, #tpu.memory_space<vmem>>, vector<16x32xf32>
    %c0_1 = arith.constant 0 : index
    %c0_2 = arith.constant 0 : index
    %1 = vector.load %arg2[%c0_1, %c0_2] : memref<32x384xf32, #tpu.memory_space<vmem>>, vector<32x384xf32>
    %cst = arith.constant dense<0.000000e+00> : vector<16x384xf32>
    %2 = tpu.matmul %0, %1, %cst {dimension_numbers = #tpu.dot_dimension_numbers<[1], [0], [0], [1], [0, 0, 1, 1], [], []>} : vector<16x32xf32>, vector<32x384xf32>, vector<16x384xf32> -> vector<16x384xf32>
    %3 = vector.extract_strided_slice %2 {offsets = [0, 0], sizes = [16, 128], strides = [1, 1]} : vector<16x384xf32> to vector<16x128xf32>
    %4 = vector.shape_cast %3 : vector<16x128xf32> to vector<2x8x128xf32>
    %5 = vector.extract_strided_slice %2 {offsets = [0, 128], sizes = [16, 128], strides = [1, 1]} : vector<16x384xf32> to vector<16x128xf32>
    %6 = vector.shape_cast %5 : vector<16x128xf32> to vector<2x8x128xf32>
    %7 = vector.extract_strided_slice %2 {offsets = [0, 256], sizes = [16, 128], strides = [1, 1]} : vector<16x384xf32> to vector<16x128xf32>
    %8 = vector.shape_cast %7 : vector<16x128xf32> to vector<2x8x128xf32>
    "tpu.trace_start"() <{level = 10 : i32, message = "bqd,bkd->bqk"}> : () -> ()
    %cst_3 = arith.constant dense<0.000000e+00> : vector<2x8x8xf32>
    %9 = tpu.matmul %4, %6, %cst_3 {dimension_numbers = #tpu.dot_dimension_numbers<[2], [2], [1], [1], [0, 0, 0, 1, 1, 1], [0], [0]>} : vector<2x8x128xf32>, vector<2x8x128xf32>, vector<2x8x8xf32> -> vector<2x8x8xf32>
    "tpu.trace_stop"() : () -> ()
    %cst_4 = arith.constant dense<0xFF800000> : vector<2x8xf32>
    %10 = vector.multi_reduction <maximumf>, %9, %cst_4 [2] : vector<2x8x8xf32> to vector<2x8xf32>
    %11 = vector.shape_cast %10 : vector<2x8xf32> to vector<2x8x1xf32>
    %12 = vector.broadcast %11 : vector<2x8x1xf32> to vector<2x8x8xf32>
    %13 = arith.subf %9, %12 : vector<2x8x8xf32>
    %14 = math.exp %13 : vector<2x8x8xf32>
    %cst_5 = arith.constant dense<0.000000e+00> : vector<2x8xf32>
    %15 = vector.multi_reduction <add>, %14, %cst_5 [2] : vector<2x8x8xf32> to vector<2x8xf32>
    %16 = vector.shape_cast %15 : vector<2x8xf32> to vector<2x8x1xf32>
    %17 = tpu.reciprocal %16 {approx = true} : vector<2x8x1xf32> -> vector<2x8x1xf32>
    %18 = vector.broadcast %17 : vector<2x8x1xf32> to vector<2x8x8xf32>
    %19 = arith.mulf %14, %18 : vector<2x8x8xf32>
    "tpu.trace_start"() <{level = 10 : i32, message = "bqk,bkd->bqd"}> : () -> ()
    %cst_6 = arith.constant dense<0.000000e+00> : vector<2x8x128xf32>
    %20 = tpu.matmul %19, %8, %cst_6 {dimension_numbers = #tpu.dot_dimension_numbers<[2], [1], [1], [2], [0, 0, 0, 1, 1, 2], [0], [0]>} : vector<2x8x8xf32>, vector<2x8x128xf32>, vector<2x8x128xf32> -> vector<2x8x128xf32>
    "tpu.trace_stop"() : () -> ()
    %21 = vector.shape_cast %20 : vector<2x8x128xf32> to vector<16x128xf32>
    %c0_7 = arith.constant 0 : index
    %c0_8 = arith.constant 0 : index
    %22 = vector.load %arg3[%c0_7, %c0_8] : memref<128x128xf32, #tpu.memory_space<vmem>>, vector<128x128xf32>
    %cst_9 = arith.constant dense<0.000000e+00> : vector<16x128xf32>
    %23 = tpu.matmul %21, %22, %cst_9 {dimension_numbers = #tpu.dot_dimension_numbers<[1], [0], [0], [1], [0, 0, 1, 1], [], []>} : vector<16x128xf32>, vector<128x128xf32>, vector<16x128xf32> -> vector<16x128xf32>
    %c0_10 = arith.constant 0 : index
    %c0_11 = arith.constant 0 : index
    %24 = vector.load %arg4[%c0_10, %c0_11] : memref<1x128xf32, #tpu.memory_space<vmem>>, vector<1x128xf32>
    %25 = vector.broadcast %24 : vector<1x128xf32> to vector<16x128xf32>
    %26 = arith.addf %23, %25 : vector<16x128xf32>
    %c0_12 = arith.constant 0 : index
    %c0_13 = arith.constant 0 : index
    %27 = vector.load %arg5[%c0_12, %c0_13] : memref<16x128xf32, #tpu.memory_space<vmem>>, vector<16x128xf32>
    tpu.vector_store %arg5[%c0_12, %c0_13], %26 {strides = array<i32>} : memref<16x128xf32, #tpu.memory_space<vmem>>, vector<16x128xf32>,
    return
  }
  func.func @transform_0(%arg0: i32) -> (i32, i32) {
    %c0_i32 = arith.constant 0 : i32
    %c0_i32_0 = arith.constant 0 : i32
    return %arg0, %c0_i32 : i32, i32
  }
  func.func @transform_1(%arg0: i32) -> (i32, i32) {
    %c0_i32 = arith.constant 0 : i32
    %c0_i32_0 = arith.constant 0 : i32
    %c0_i32_1 = arith.constant 0 : i32
    return %c0_i32, %c0_i32_0 : i32, i32
  }
  func.func @transform_2(%arg0: i32) -> (i32, i32) {
    %c0_i32 = arith.constant 0 : i32
    %c0_i32_0 = arith.constant 0 : i32
    %c0_i32_1 = arith.constant 0 : i32
    return %c0_i32, %c0_i32_0 : i32, i32
  }
  func.func @transform_3(%arg0: i32) -> (i32, i32) {
    %c0_i32 = arith.constant 0 : i32
    %c0_i32_0 = arith.constant 0 : i32
    %c0_i32_1 = arith.constant 0 : i32
    return %c0_i32, %c0_i32_0 : i32, i32
  }
  func.func @transform_4(%arg0: i32) -> (i32, i32) {
    %c0_i32 = arith.constant 0 : i32
    %c0_i32_0 = arith.constant 0 : i32
    return %arg0, %c0_i32 : i32, i32
  }
}

</mosaic_0001>

<bundles_post_ra>
// kernel: tpu_custom_call.1
= control target key start
LH: loop header
LB: loop body
LE: loop exit
PB: predicated region body
PF: predicated region fallthrough
CT: control target
= control target key end

     0   :  { %9 = vsyncpa [#allocation3], 0  ;;  %s1042_s0 = inlined_call_operand.hbm [shape: f32[16,32], index: 0, kind: input, shape index: {}]   ;;  %s1043_s1 = inlined_call_operand.hbm [shape: f32[32,384], index: 1, kind: input, shape index: {}]   ;;  %s1044_s2 = inlined_call_operand.hbm [shape: f32[128,128], index: 2, kind: input, shape index: {}]   ;;  %s1045_s3 = inlined_call_operand.vmem [shape: f32[1,128], index: 3, kind: input, shape index: {}]   ;;  %s1046_s4 = inlined_call_operand.hbm [shape: f32[16,128], index: 4, kind: output, shape index: {}]  }
   0x1   :  { %10 = vsyncpa [#allocation6], 0 }
   0x2   :  { %11 = vsyncpa [#allocation4], 0  ;;  %s924_s15 = smov [#allocation5]   ;;  %s830_s19 = scalar_lea.hbm %s1043_s1, 1536 }
   0x3   :  { %s29_s16 = sshll.u32 %s924_s15, 4  ;;  %p831_p0 = scmp.ne.s32.totalorder %s1043_s1, %s830_s19  ;;  %s30_s16 = int_to_ptr.vmem [resolvable:$true] %s29_s16 }
   0x4   :  { %p834_p1 = scmp.lt.u32.totalorder %s830_s19, %s1043_s1 }
   0x6   :  { %p836_p2 = pnand %p834_p1, %p831_p0 }
   0x8   :  { %839 = shalt.err (!%p836_p2)
}
   0x9   :  { %s840_s24 = scalar_lea.vmem %s30_s16, 1536  ;;  %p845_p4 = scmp.lt.s32.totalorder %s30_s16, %s30_s16 }
   0xa   :  { %p841_p3 = scmp.ne.s32.totalorder %s30_s16, %s840_s24  ;;  %p846_p5 = scmp.lt.s32.totalorder %s840_s24, %s840_s24 }
   0xc   :  { %p847_p6 = por %p846_p5, %p845_p4 }
   0xe   :  { %p848_p7 = pnand %p847_p6, %p841_p3 }
  0x10   :  { %851 = shalt.err (!%p848_p7)
}
  0x11   :  { %s925_s25 = smov 384   ;;  %s926_s26 = smov 24  }
  0x12   :  { %35 = dma.hbm_to_vmem [thread:$0]  %s1043_s1, 1536, %s30_s16, [#allocation6], %s925_s25, %s925_s25, %s926_s26  }
  0x13   :  { %s927_s29 = smov [#allocation2]   ;;  %s852_s7 = scalar_lea.hbm %s1042_s0, 256 }
  0x14   :  { %s17_s30 = sshll.u32 %s927_s29, 4  ;;  %p853_p8 = scmp.ne.s32.totalorder %s1042_s0, %s852_s7  ;;  %s18_s30 = int_to_ptr.vmem [resolvable:$true] %s17_s30 }
  0x15   :  { %p856_p9 = scmp.lt.u32.totalorder %s852_s7, %s1042_s0 }
  0x17   :  { %p858_p10 = pnand %p856_p9, %p853_p8 }
  0x19   :  { %861 = shalt.err (!%p858_p10)
}
  0x1a   :  { %s862_s12 = scalar_lea.vmem %s18_s30, 256  ;;  %p867_p12 = scmp.lt.s32.totalorder %s18_s30, %s18_s30 }
  0x1b   :  { %p863_p11 = scmp.ne.s32.totalorder %s18_s30, %s862_s12  ;;  %p868_p13 = scmp.lt.s32.totalorder %s862_s12, %s862_s12 }
  0x1d   :  { %p869_p0 = por %p868_p13, %p867_p12 }
  0x1f   :  { %p870_p1 = pnand %p869_p0, %p863_p11 }
  0x21   :  { %873 = shalt.err (!%p870_p1)
}
  0x22   :  { %s928_s1 = smov 128   ;;  %s929_s13 = smov 8  }
  0x23   :  { %23 = dma.hbm_to_vmem [thread:$0]  %s1042_s0, 256, %s18_s30, [#allocation3], %s928_s1, %s928_s1, %s929_s13  }
  0x24   :  { %s930_s16 = smov [#allocation7]   ;;  %s874_s20 = scalar_lea.hbm %s1044_s2, 2048 }
  0x25   :  { %s41_s17 = sshll.u32 %s930_s16, 4  ;;  %p875_p2 = scmp.ne.s32.totalorder %s1044_s2, %s874_s20  ;;  %s42_s17 = int_to_ptr.vmem [resolvable:$true] %s41_s17 }
  0x26   :  { %p878_p3 = scmp.lt.u32.totalorder %s874_s20, %s1044_s2 }
  0x28   :  { %p880_p4 = pnand %p878_p3, %p875_p2 }
  0x2a   :  { %883 = shalt.err (!%p880_p4)
}
  0x2b   :  { %s884_s25 = scalar_lea.vmem %s42_s17, 2048  ;;  %p889_p6 = scmp.lt.s32.totalorder %s42_s17, %s42_s17 }
  0x2c   :  { %p885_p5 = scmp.ne.s32.totalorder %s42_s17, %s884_s25  ;;  %p890_p7 = scmp.lt.s32.totalorder %s884_s25, %s884_s25 }
  0x2e   :  { %p891_p8 = por %p890_p7, %p889_p6 }
  0x30   :  { %p892_p9 = pnand %p891_p8, %p885_p5 }
  0x32   :  { %895 = shalt.err (!%p892_p9)
}
  0x33   :  { %47 = dma.hbm_to_vmem [thread:$0]  %s1044_s2, 2048, %s42_s17, [#allocation6], %s928_s1, %s928_s1, %s929_s13  }
  0x34   :  { %918 = dma.done.wait [#allocation3], 256  }
  0x35   :  { %919 = vsyncadd [#allocation3], 4294967040 }
  0x36   :  { %920 = dma.done.wait [#allocation6], 3584  }
  0x37   :  { %921 = vsyncadd [#allocation6], 4294963712  ;;  %v931_v0 = vmov 0.0   ;;  %v62_v1 = vld [vmem:[#allocation5 + $0x8] sm:$0xff]  ;;  %v65_v2 = vld [vmem:[#allocation5 + $0x20] sm:$0xff]  ;;  %vm73_vm0 = vcmask 261120  }
  0x38   :  { %144 = vmatprep.mubr.f32.mxu0 %v931_v0  ;;  %v61_v3 = vld [vmem:[#allocation5] sm:$0xff]  ;;  %v764_v4 = vpack.c.bf16 %v65_v2, %v62_v1  ;;  %v64_v5 = vld [vmem:[#allocation5 + $0x18] sm:$0xff]  ;;  %v71_v7 = vld [vmem:[#allocation5 + $0x50] sm:$0xff]  ;;  %vm932_vm1 = vmmov 0   ;;  %vm372_vm2 = vcmask 64512   ;;  %s933_s28 = smov [#allocation8]  }
  0x39   :  { %v68_v6 = vld [vmem:[#allocation5 + $0x38] sm:$0xff]  ;;  %v766_v8 = vpack.c.bf16 %v64_v5, %v61_v3  ;;  %v67_v10 = vld [vmem:[#allocation5 + $0x30] sm:$0xff]  ;;  %v70_v11 = vld [vmem:[#allocation5 + $0x48] sm:$0xff]  ;;  %s646_s29 = sshll.u32 %s933_s28, 4  ;;  %s647_s29 = int_to_ptr.vmem [resolvable:$true] %s646_s29 }
  0x3a   :  { %v768_v9 = vpack.c.bf16 %v71_v7, %v68_v6  ;;  %765 = vmatprep.subr.bf16.mxu0 %v764_v4  ;;  %v63_v12 = vld [vmem:[#allocation5 + $0x10] sm:$0xff]  ;;  %v66_v13 = vld [vmem:[#allocation5 + $0x28] sm:$0xff]  ;;  %v770_v14 = vpack.c.bf16 %v70_v11, %v67_v10  ;;  %v69_v16 = vld [vmem:[#allocation5 + $0x40] sm:$0xff]  ;;  %s896_s30 = scalar_lea.vmem %s647_s29, 256  ;;  %p901_p11 = scmp.lt.s32.totalorder %s647_s29, %s647_s29 }
  0x3b   :  { %767 = vmatpush1.bf16.msra.mxu0 %v766_v8  ;;  %v772_v15 = vpack.c.bf16 %v66_v13, %v63_v12  ;;  %v72_v17 = vld [vmem:[#allocation5 + $0x58] sm:$0xff]  ;;  %v59_v18 = vld [vmem:[#allocation2] sm:$0xff]  ;;  %v541_v43 = vld [vmem:[#allocation7] sm:$0xff]  ;;  %p897_p10 = scmp.ne.s32.totalorder %s647_s29, %s896_s30  ;;  %p902_p12 = scmp.lt.s32.totalorder %s896_s30, %s896_s30 }
  0x3c   :  { %769 = vmatprep.subr.bf16.mxu0 %v768_v9  ;;  %v776_v19 = vpack.c.bf16 %v72_v17, %v69_v16  ;;  %v60_v20 = vld [vmem:[#allocation2 + $0x8] sm:$0xff]  ;;  %v542_v44 = vld [vmem:[#allocation7 + $0x8] sm:$0xff]  ;;  %v543_v45 = vld [vmem:[#allocation7 + $0x10] sm:$0xff] }
  0x3d   :  { %v780_v46 = vpack.c.bf16 %v542_v44, %v541_v43  ;;  %v544_v47 = vld [vmem:[#allocation7 + $0x18] sm:$0xff]  ;;  %v545_v49 = vld [vmem:[#allocation7 + $0x20] sm:$0xff]  ;;  %v546_v50 = vld [vmem:[#allocation7 + $0x28] sm:$0xff]  ;;  %p903_p13 = por %p902_p12, %p901_p11 }
  0x3e   :  { %v784_v48 = vpack.c.bf16 %v544_v47, %v543_v45  ;;  %v788_v51 = vpack.c.bf16 %v546_v50, %v545_v49  ;;  %v547_v52 = vld [vmem:[#allocation7 + $0x30] sm:$0xff]  ;;  %v548_v53 = vld [vmem:[#allocation7 + $0x38] sm:$0xff]  ;;  %v549_v55 = vld [vmem:[#allocation7 + $0x40] sm:$0xff] }
  0x3f   :  { %771 = vmatpush1.bf16.msra.mxu0 %v770_v14  ;;  %781 = vmatprep.subr.bf16.mxu1 %v780_v46  ;;  %v792_v54 = vpack.c.bf16 %v548_v53, %v547_v52  ;;  %v550_v56 = vld [vmem:[#allocation7 + $0x48] sm:$0xff]  ;;  %v551_v58 = vld [vmem:[#allocation7 + $0x50] sm:$0xff]  ;;  %v552_v59 = vld [vmem:[#allocation7 + $0x58] sm:$0xff]  ;;  %p904_p0 = pnand %p903_p13, %p897_p10 }
  0x40   :  { %773 = vmatprep.subr.bf16.mxu0 %v772_v15  ;;  %783 = vmatpush3.bf16.msra.mxu1 %v780_v46  ;;  %v796_v57 = vpack.c.bf16 %v550_v56, %v549_v55  ;;  %v800_v60 = vpack.c.bf16 %v552_v59, %v551_v58  ;;  %v553_v61 = vld [vmem:[#allocation7 + $0x60] sm:$0xff]  ;;  %v554_v62 = vld [vmem:[#allocation7 + $0x68] sm:$0xff]  ;;  %v555_v7 = vld [vmem:[#allocation7 + $0x70] sm:$0xff] }
  0x41   :  { %785 = vmatprep.subr.bf16.mxu1 %v784_v48  ;;  %v804_v63 = vpack.c.bf16 %v554_v62, %v553_v61  ;;  %v556_v8 = vld [vmem:[#allocation7 + $0x78] sm:$0xff]  ;;  %v665_v14 = vld [vmem:[%s1045_s3] ss:$0 sm:$0xff] }
  0x42   :  { %659 = vmatmul.mubr.msk.f32.vlgmr.msra.gmra.mrb[0].mxu0 %vm73_vm0, %v59_v18  ;;  %v808_v9 = vpack.c.bf16 %v556_v8, %v555_v7 }
  0x43   :  { %150 = vmatprep.mubr.f32.mxu0 %v931_v0  ;;  %775 = vmatpush3.bf16.msra.mxu0 %v772_v15 }
  0x44   :  { %777 = vmatprep.subr.bf16.mxu0 %v776_v19  ;;  %787 = vmatpush3.bf16.msra.mxu1 %v784_v48 }
  0x45   :  { %789 = vmatprep.subr.bf16.mxu1 %v788_v51 }
  0x46   :  { %660 = vmatmul.mubr.msk.f32.gmra.mrb[2].mxu0 %vm73_vm0, %v60_v20 }
  0x47   :  { %779 = vmatpush3.bf16.msra.mxu0 %v776_v19  ;;  %706 = vmatprep.mubr.msk.f32.mxu0 %vm73_vm0, %v59_v18 }
  0x48   :  { %709 = vmatprep.subr.mxu0 %v931_v0  ;;  %791 = vmatpush3.bf16.msra.mxu1 %v788_v51 }
  0x49   :  { %793 = vmatprep.subr.bf16.mxu1 %v792_v54 }
  0x4a   :  { %707 = vmatmul.mubr.msk.f32.vlgmr.msra.gmra.mrb[4].mxu0 %vm73_vm0, %v60_v20 }
  0x4b   :  { %711 = vmatprep.mubr.msk.f32.mxu0 %vm932_vm1, %v931_v0 }
  0x4c   :  { %795 = vmatpush3.bf16.msra.mxu1 %v792_v54 }
  0x4d   :  { %797 = vmatprep.subr.bf16.mxu1 %v796_v57 }
  0x50   :  { %799 = vmatpush3.bf16.msra.mxu1 %v796_v57 }
  0x51   :  { %801 = vmatprep.subr.bf16.mxu1 %v800_v60 }
  0x54   :  { %803 = vmatpush3.bf16.msra.mxu1 %v800_v60 }
  0x55   :  { %805 = vmatprep.subr.bf16.mxu1 %v804_v63 }
  0x58   :  { %807 = vmatpush3.bf16.msra.mxu1 %v804_v63 }
  0x59   :  { %809 = vmatprep.subr.bf16.mxu1 %v808_v9 }
  0x5c   :  { %811 = vmatpush3.bf16.msra.mxu1 %v808_v9 }
 0x115   :  { %v146_v21 = vpop.f32.mrb[0].mxu0 }
 0x116   :  { %v148_v22 = vpop.f32.mrb[1].mxu0 }
 0x117   :  { %710 = vmatpush3.xpose.msra.mxu0 %v148_v22 }
 0x118   :  { %714 = vmatprep.subr.mxu0 %v931_v0 }
 0x119   :  { %v152_v23 = vpop.f32.mrb[2].mxu0 }
 0x11a   :  { %v154_v24 = vpop.f32.mrb[3].mxu0  ;;  %712 = vmatmul.mubr.f32.vlgmr.msra.gmra.mrb[6].mxu0 %v146_v21 }
 0x11b   :  { %715 = vmatpush3.xpose.msra.mxu0 %v154_v24  ;;  %716 = vmatprep.mubr.msk.f32.mxu0 %vm932_vm1, %v931_v0 }
 0x11c   :  { %719 = vmatprep.subr.mxu0 %v931_v0 }
 0x11d   :  { %v1010_v25 = vpop.f32.mrb[4].mxu0 }
 0x11e   :  { %717 = vmatmul.mubr.f32.vlgmr.msra.gmra.mrb[8].mxu0 %v152_v23  ;;  %v223_v26 = vpop.f32.mrb[5].mxu0 }
 0x11f   :  { %720 = vmatpush3.msra.mxu0 %v223_v26  ;;  %721 = vmatprep.mubr.msk.f32.mxu0 %vm932_vm1, %v931_v0 }
 0x120   :  { %724 = vmatprep.subr.mxu0 %v931_v0 }
 0x1ed   :  { %v298_v27 = vpop.f32.mrb[6].mxu0 }
 0x1ee   :  { %v713_v28 = vpop.f32.mrb[7].mxu0  ;;  %v373_v29 = vsel %vm372_vm2, %v298_v27, -inf }
 0x1ef   :  { %374 = vmax.xlane.f32.xlu0 %v373_v29 }
 0x1f1   :  { %v368_v30 = vpop.f32.mrb[8].mxu0 }
 0x1f2   :  { %v718_v31 = vpop.f32.mrb[9].mxu0  ;;  %v376_v32 = vsel %vm372_vm2, %v368_v30, -inf }
 0x1f3   :  { %377 = vmax.xlane.f32.xlu0 %v376_v32 }
 0x27c   :  { %v375_v33 = vpop.xlane.xlu0 %374 }
 0x27d   :  { %v379_v34 = vsub.f32 %v298_v27, %v375_v33 }
 0x27f   :  { %v381_v35 = vmul.f32 1.442695, %v379_v34 }
 0x280   :  { %v378_v36 = vpop.xlane.xlu0 %377 }
 0x281   :  { %822 = vpow2.f32 %v381_v35  ;;  %v380_v37 = vsub.f32 %v368_v30, %v378_v36 }
 0x283   :  { %v383_v38 = vmul.f32 1.442695, %v380_v37 }
 0x285   :  { %824 = vpow2.f32 %v383_v38 }
 0x28b   :  { %v823_v39 = vpop.eup %822 }
 0x28c   :  { %v385_v40 = vsel %vm372_vm2, %v823_v39, 0.0 }
 0x28d   :  { %386 = vadd.xlane.f32.xlu1 %v385_v40 }
 0x28f   :  { %v825_v41 = vpop.eup %824 }
 0x290   :  { %v388_v42 = vsel %vm372_vm2, %v825_v41, 0.0 }
 0x291   :  { %389 = vadd.xlane.f32.xlu1 %v388_v42 }
 0x31a   :  { %v387_v1 = vpop.xlane.xlu1 %386 }
 0x31b   :  { %826 = vrcp.f32 %v387_v1 }
 0x31e   :  { %v390_v2 = vpop.xlane.xlu1 %389 }
 0x31f   :  { %828 = vrcp.f32 %v390_v2 }
 0x325   :  { %v827_v3 = vpop.eup %826 }
 0x326   :  { %v393_v4 = vmul.f32 %v827_v3, %v823_v39 }
 0x328   :  { %722 = vmatmul.mubr.msk.f32.vlgmr.msra.gmra.mrb[10].mxu0 %vm372_vm2, %v393_v4 }
 0x329   :  { %v829_v5 = vpop.eup %828  ;;  %725 = vmatpush3.msra.mxu0 %v1010_v25  ;;  %726 = vmatprep.mubr.msk.f32.mxu0 %vm932_vm1, %v931_v0 }
 0x32a   :  { %v394_v6 = vmul.f32 %v829_v5, %v825_v41 }
 0x32c   :  { %727 = vmatmul.mubr.msk.f32.vlgmr.msra.gmra.mrb[12].mxu0 %vm372_vm2, %v394_v6 }
 0x3fb   :  { %v464_v10 = vpop.f32.mrb[10].mxu0 }
 0x3fc   :  { %v723_v11 = vpop.f32.mrb[11].mxu0  ;;  %761 = vmatprep.mubr.f32.mxu1 %v464_v10 }
 0x3ff   :  { %v537_v12 = vpop.f32.mrb[12].mxu0 }
 0x400   :  { %v728_v13 = vpop.f32.mrb[13].mxu0  ;;  %762 = vmatmul.mubr.f32.vlgmr.msra.gmra.mrb[0].mxu1 %v537_v12 }
 0x4d3   :  { %v763_v0 = vpop.f32.mrb[0].mxu1 }
 0x4d4   :  { %v636_v15 = vadd.f32 %v763_v0, %v665_v14  ;;  %v630_v16 = vpop.f32.mrb[1].mxu1 }
 0x4d5   :  { %v631_v17 = vadd.f32 %v665_v14, %v630_v16 }
 0x4d6   :  { %640 = vst [vmem:[#allocation8 + $0x8] sm:$0xff] %v636_v15 }
 0x4d7   :  { %639 = vst [vmem:[#allocation8] sm:$0xff] %v631_v17 }
 0x4d8   :  { %907 = shalt.err (!%p904_p0)
}
 0x4d9   :  { %s908_s3 = scalar_lea.hbm %s1046_s4, 256 }
 0x4da   :  { %p909_p1 = scmp.ne.s32.totalorder %s1046_s4, %s908_s3  ;;  %p912_p2 = scmp.lt.u32.totalorder %s908_s3, %s1046_s4 }
 0x4dc   :  { %p914_p3 = pnand %p912_p2, %p909_p1 }
 0x4de   :  { %917 = shalt.err (!%p914_p3)
}
 0x4df   :  { %652 = dma.vmem_to_hbm [thread:$0]  %s647_s29, 256, %s1046_s4, [#allocation4], %s928_s1, %s928_s1, %s929_s13  }
 0x4e0   :  { %922 = dma.done.wait [#allocation4], 256  }
 0x4e1   :  { %923 = vsyncadd [#allocation4], 4294967040 }
 0x4e2   :  { %656 = vsyncpa [#allocation3], 1 }
 0x4e3   :  { %657 = vsyncpa [#allocation6], 1 }
 0x4e4   :  { %658 = vsyncpa [#allocation4], 1 }

</bundles_post_ra>
